<compile_context>
chip_gen: v6e
topology: v6e:2x2x1
jax: 0.10.0
libtpu: 0.0.40
codegen_flags: <defaults>
</compile_context>

<pallas_src>
import functools

import jax
import jax.numpy as jnp
from jax import lax
from jax.experimental import pallas as pl
from jax.experimental.pallas import tpu as pltpu


def _round_up(x, m):
    return ((x + m - 1) // m) * m


def _gru_fc_kernel(x_ref, w_ih_ref, w_hh_ref, b_gi_ref, b_hn_ref,
                   w_fc_ref, b_fc_ref, out_ref, h_ref, gi_ref,
                   *, T, Tc, H, B_pad, n_chunks, unroll, mxu_dtype):
    """One grid step == one chunk of Tc timesteps.

    x_ref:    (Tc*B_pad, D)   time-major rows, batch padded to a sublane multiple
    w_ih_ref: (D, 3H)         stacked input->gate weights, columns [r | z | n]
    w_hh_ref: (H, 3H)         stacked hidden->gate weights
    b_gi_ref: (1, 3H)         folded bias for the input projection (f32)
    b_hn_ref: (1, H)          hidden bias of the n gate (r-gated, kept separate)
    w_fc_ref: (H, O)          final linear (f32, used once)
    b_fc_ref: (1, O)
    out_ref:  (B_pad, O)      written only after the last chunk
    h_ref:    (B_pad, H)      VMEM scratch: hidden state, persists across chunks
    gi_ref:   (Tc*B_pad, 3H)  VMEM scratch: hoisted input projections for the chunk
    """
    c = pl.program_id(0)

    @pl.when(c == 0)
    def _():
        h_ref[...] = jnp.zeros_like(h_ref)

    # ---- Phase 1: whole-chunk input projection as ONE MXU matmul (off the
    #      serial path). Bias is added here, once per chunk, in f32.
    gi_ref[...] = (
        jnp.dot(x_ref[...], w_ih_ref[...], preferred_element_type=jnp.float32)
        + b_gi_ref[...]
    )

    # ---- Phase 2: serial GRU recurrence over the VMEM-resident chunk.
    w_hh = w_hh_ref[...]                                   # (H, 3H), MXU dtype
    b_hn = jnp.broadcast_to(b_hn_ref[...], (B_pad, H))     # hoisted (no per-step broadcast)
    pad_T = (n_chunks * Tc) != T                           # static Python bool

    def step(t, h):
        row = pl.multiple_of(t * B_pad, B_pad)             # sublane-aligned slice start
        gi = gi_ref[pl.ds(row, B_pad), :]                  # (B_pad, 3H) f32
        gh = jnp.dot(h.astype(mxu_dtype), w_hh,
                     preferred_element_type=jnp.float32)   # (B_pad, 3H) f32
        # r|z are lanes 0..127 -> one 128-lane sigmoid for both gates.
        rz = jax.nn.sigmoid(gi[:, :2 * H] + gh[:, :2 * H])
        r = rz[:, :H]
        z = rz[:, H:]
        # PyTorch: n = tanh(W_in x + b_in + r * (W_hn h + b_hn))
        n = jnp.tanh(gi[:, 2 * H:] + r * (gh[:, 2 * H:] + b_hn))
        h_new = n + z * (h - n)                            # == (1-z)*n + z*h
        if pad_T:  # only emitted when T was zero-padded to a chunk multiple
            h_new = jnp.where(c * Tc + t < T, h_new, h)
        return h_new

    h_last = lax.fori_loop(0, Tc, step, h_ref[...], unroll=unroll)
    h_ref[...] = h_last

    # ---- Final FC, only once after the last chunk (kept in f32; done a single time).
    @pl.when(c == n_chunks - 1)
    def _():
        out_ref[...] = (
            jnp.dot(h_last, w_fc_ref[...], preferred_element_type=jnp.float32)
            + b_fc_ref[...]
        ).astype(out_ref.dtype)


@functools.partial(jax.jit, static_argnames=("hidden", "chunk_t", "mxu_dtype"))
def gru_test_forward(x, params, hidden=64, chunk_t=None, mxu_dtype=jnp.bfloat16):
    """x: (B, T, D) float32 -> out: (B, O) (caller squeezes dim 1 if O == 1)."""
    B, T, D = x.shape
    H = hidden
    O = params["w_fc"].shape[1]
    B_pad = _round_up(B, 8)                       # sublane alignment for per-step slices

    w_ih = params["w_ih"].astype(mxu_dtype)       # (D, 3H), columns [r | z | n]
    w_hh = params["w_hh"].astype(mxu_dtype)       # (H, 3H)
    b_ih = params["b_ih"].astype(jnp.float32)     # (3H,)
    b_hh = params["b_hh"].astype(jnp.float32)     # (3H,)
    w_fc = params["w_fc"].astype(jnp.float32)     # (H, O)  -- used once, keep f32
    b_fc = params["b_fc"].astype(jnp.float32).reshape(1, O)

    # Fold biases: b_hr / b_hz are plain additions -> fold into the input-projection
    # bias; b_hn stays separate (it is multiplied by r inside tanh).
    b_gi = (b_ih + jnp.concatenate([b_hh[:2 * H],
                                    jnp.zeros((H,), jnp.float32)])).reshape(1, 3 * H)
    b_hn = b_hh[2 * H:].reshape(1, H)

    # VMEM budget for the resident chunk, using (8,128)-padded tile sizes:
    #   x block (double-buffered): 2 * B_pad * roundup(D,128)  * itemsize(mxu)  per t
    #   gi scratch               :     B_pad * roundup(3H,128) * 4              per t
    mxu_bytes = jnp.dtype(mxu_dtype).itemsize
    per_t = (2 * B_pad * _round_up(D, 128) * mxu_bytes
             + B_pad * _round_up(3 * H, 128) * 4)
    budget_t = max(1, (16 * 1024 * 1024) // per_t)     # keep chunk footprint <= ~16 MiB
    Tc = max(1, min(int(chunk_t) if chunk_t is not None else 512, T, budget_t))
    n_chunks = pl.cdiv(T, Tc)
    T_pad = n_chunks * Tc

    # Time-major, batch padded, flattened to a lane-dense 2D slab (reshape done in
    # the wrapper so nothing crosses a tile boundary in-kernel).
    x_tbd = jnp.transpose(x, (1, 0, 2))                            # (T, B, D)
    x_tbd = jnp.pad(x_tbd, ((0, T_pad - T), (0, B_pad - B), (0, 0)))
    x_2d = x_tbd.reshape(T_pad * B_pad, D).astype(mxu_dtype)       # (T_pad*B_pad, D)

    # Always unroll the serial recurrence (fully for short chunks, by 8 otherwise)
    # so the LLO scheduler can overlap consecutive steps.
    unroll = Tc if Tc <= 32 else 8

    kernel = functools.partial(_gru_fc_kernel, T=T, Tc=Tc, H=H, B_pad=B_pad,
                               n_chunks=n_chunks, unroll=unroll, mxu_dtype=mxu_dtype)

    out = pl.pallas_call(
        kernel,
        out_shape=jax.ShapeDtypeStruct((B_pad, O), jnp.float32),
        grid=(n_chunks,),
        in_specs=[
            pl.BlockSpec((Tc * B_pad, D), lambda c: (c, 0)),   # x chunk (time-major rows)
            pl.BlockSpec((D, 3 * H), lambda c: (0, 0)),        # stacked W_ih
            pl.BlockSpec((H, 3 * H), lambda c: (0, 0)),        # stacked W_hh
            pl.BlockSpec((1, 3 * H), lambda c: (0, 0)),        # folded projection bias
            pl.BlockSpec((1, H), lambda c: (0, 0)),            # b_hn
            pl.BlockSpec((H, O), lambda c: (0, 0)),            # W_fc
            pl.BlockSpec((1, O), lambda c: (0, 0)),            # b_fc
        ],
        out_specs=pl.BlockSpec((B_pad, O), lambda c: (0, 0)),
        scratch_shapes=[
            pltpu.VMEM((B_pad, H), jnp.float32),               # hidden state (persists)
            pltpu.VMEM((Tc * B_pad, 3 * H), jnp.float32),      # chunk input projections
        ],
        compiler_params=pltpu.CompilerParams(
            dimension_semantics=("arbitrary",),                # chunk recurrence is sequential
            vmem_limit_bytes=32 * 1024 * 1024,
        ),
    )(x_2d, w_ih, w_hh, b_gi, b_hn, w_fc, b_fc)
    return out[:B]


def init_params(key, input_dim, hidden, output_size):
    """Deterministic init matching PyTorch shapes (uniform +/- 1/sqrt(H)),
    stored in the kernel's stacked layout (gate columns in PyTorch order [r, z, n])."""
    k = jax.random.split(key, 6)
    H, D, O = hidden, input_dim, output_size
    s = 1.0 / jnp.sqrt(jnp.float32(H))
    w_ih_pt = jax.random.uniform(k[0], (3 * H, D), jnp.float32, -s, s)   # weight_ih_l0
    w_hh_pt = jax.random.uniform(k[1], (3 * H, H), jnp.float32, -s, s)   # weight_hh_l0
    b_ih_pt = jax.random.uniform(k[2], (3 * H,), jnp.float32, -s, s)
    b_hh_pt = jax.random.uniform(k[3], (3 * H,), jnp.float32, -s, s)
    w_fc_pt = jax.random.uniform(k[4], (O, H), jnp.float32, -s, s)
    b_fc_pt = jax.random.uniform(k[5], (O,), jnp.float32, -s, s)
    return {
        "w_ih": w_ih_pt.T,   # (D, 3H)
        "w_hh": w_hh_pt.T,   # (H, 3H)
        "b_ih": b_ih_pt,     # (3H,)
        "b_hh": b_hh_pt,     # (3H,)
        "w_fc": w_fc_pt.T,   # (H, O)
        "b_fc": b_fc_pt,     # (O,)
    }


def reference_forward(x, params, hidden=64):
    """Pure-JAX reference of the PyTorch GRU_TEST forward (for validation)."""
    H = hidden
    w_ih, w_hh = params["w_ih"], params["w_hh"]
    b_ih, b_hh = params["b_ih"], params["b_hh"]

    def step(h, x_t):
        gi = x_t @ w_ih + b_ih
        gh = h @ w_hh + b_hh
        r = jax.nn.sigmoid(gi[:, :H] + gh[:, :H])
        z = jax.nn.sigmoid(gi[:, H:2 * H] + gh[:, H:2 * H])
        n = jnp.tanh(gi[:, 2 * H:] + r * gh[:, 2 * H:])
        return (1.0 - z) * n + z * h, None

    h0 = jnp.zeros((x.shape[0], H), jnp.float32)
    h_last, _ = lax.scan(step, h0, jnp.transpose(x, (1, 0, 2)))
    return h_last @ params["w_fc"] + params["b_fc"]


if __name__ == "__main__":
    # Small shapes consistent with the module: x is (batch, seq, input_dim).
    B, T, D, H, O = 4, 8, 16, 64, 2

    key = jax.random.PRNGKey(0)
    kx, kp = jax.random.split(key)
    x = jax.random.normal(kx, (B, T, D), jnp.float32)
    params = init_params(kp, D, H, O)

    ref = reference_forward(x, params, hidden=H)

    # f32 MXU path: should match the pure-f32 reference tightly.
    out_f32 = jax.block_until_ready(
        gru_test_forward(x, params, hidden=H, mxu_dtype=jnp.float32))
    # bf16 MXU path (default performance path): f32 accumulation, looser tolerance.
    out_bf16 = jax.block_until_ready(gru_test_forward(x, params, hidden=H))

    if O == 1:  # matches .squeeze(dim=1)
        ref, out_f32, out_bf16 = ref[:, 0], out_f32[:, 0], out_bf16[:, 0]

    assert out_f32.shape == ref.shape and out_bf16.shape == ref.shape
    err32 = float(jnp.max(jnp.abs(out_f32 - ref)))
    err16 = float(jnp.max(jnp.abs(out_bf16 - ref)))
    assert err32 < 2e-4, f"f32-path mismatch vs. reference: {err32}"
    assert err16 < 2e-2, f"bf16-path mismatch vs. reference: {err16}"
    print("KERNEL_OK")
</pallas_src>

<mosaic_0001>
module attributes {stable_mosaic.version = 11 : i64} {
  func.func @_gru_fc_kernel(%arg0: i32, %arg1: memref<64x16xf32, #tpu.memory_space<vmem>>, %arg2: memref<16x192xf32, #tpu.memory_space<vmem>>, %arg3: memref<64x192xf32, #tpu.memory_space<vmem>>, %arg4: memref<1x192xf32, #tpu.memory_space<vmem>>, %arg5: memref<1x64xf32, #tpu.memory_space<vmem>>, %arg6: memref<64x2xf32, #tpu.memory_space<vmem>>, %arg7: memref<1x2xf32, #tpu.memory_space<vmem>>, %arg8: memref<8x2xf32, #tpu.memory_space<vmem>>, %arg9: memref<8x64xf32, #tpu.memory_space<vmem>>, %arg10: memref<64x192xf32, #tpu.memory_space<vmem>>) attributes {dimension_semantics = [#tpu.dimension_semantics<arbitrary>], iteration_bounds = array<i64: 1>, scalar_prefetch = 0 : i64, scratch_operands = 2 : i64, tpu.core_type = #tpu.core_type<tc>, window_params = [{transform_indices = @transform_0, window_bounds = array<i64: 64, 16>}, {pipeline_mode = #tpu.pipeline_mode<synchronous>, transform_indices = @transform_1, window_bounds = array<i64: 16, 192>}, {pipeline_mode = #tpu.pipeline_mode<synchronous>, transform_indices = @transform_2, window_bounds = array<i64: 64, 192>}, {pipeline_mode = #tpu.pipeline_mode<synchronous>, transform_indices = @transform_3, window_bounds = array<i64: 1, 192>}, {pipeline_mode = #tpu.pipeline_mode<synchronous>, transform_indices = @transform_4, window_bounds = array<i64: 1, 64>}, {pipeline_mode = #tpu.pipeline_mode<synchronous>, transform_indices = @transform_5, window_bounds = array<i64: 64, 2>}, {pipeline_mode = #tpu.pipeline_mode<synchronous>, transform_indices = @transform_6, window_bounds = array<i64: 1, 2>}, {pipeline_mode = #tpu.pipeline_mode<synchronous>, transform_indices = @transform_7, window_bounds = array<i64: 8, 2>}]} {
    %c0_i32 = arith.constant 0 : i32
    %0 = arith.cmpi eq, %arg0, %c0_i32 : i32
    %1 = arith.extui %0 : i1 to i32
    %c0_i32_0 = arith.constant 0 : i32
    %2 = arith.cmpi ne, %1, %c0_i32_0 : i32
    scf.if %2 {
      %cst_51 = arith.constant 0.000000e+00 : f32
      %211 = vector.broadcast %cst_51 : f32 to vector<8x64xf32>
      %c0_52 = arith.constant 0 : index
      %c0_53 = arith.constant 0 : index
      %212 = vector.load %arg9[%c0_52, %c0_53] : memref<8x64xf32, #tpu.memory_space<vmem>>, vector<8x64xf32>
      tpu.vector_store %arg9[%c0_52, %c0_53], %211 {strides = array<i32>} : memref<8x64xf32, #tpu.memory_space<vmem>>, vector<8x64xf32>,
    } else {
    }
    %c0 = arith.constant 0 : index
    %c0_1 = arith.constant 0 : index
    %3 = vector.load %arg1[%c0, %c0_1] : memref<64x16xf32, #tpu.memory_space<vmem>>, vector<64x16xf32>
    %c0_2 = arith.constant 0 : index
    %c0_3 = arith.constant 0 : index
    %4 = vector.load %arg2[%c0_2, %c0_3] : memref<16x192xf32, #tpu.memory_space<vmem>>, vector<16x192xf32>
    %cst = arith.constant dense<0.000000e+00> : vector<64x192xf32>
    %5 = tpu.matmul %3, %4, %cst {dimension_numbers = #tpu.dot_dimension_numbers<[1], [0], [0], [1], [0, 0, 1, 1], [], []>} : vector<64x16xf32>, vector<16x192xf32>, vector<64x192xf32> -> vector<64x192xf32>
    %c0_4 = arith.constant 0 : index
    %c0_5 = arith.constant 0 : index
    %6 = vector.load %arg4[%c0_4, %c0_5] : memref<1x192xf32, #tpu.memory_space<vmem>>, vector<1x192xf32>
    %7 = vector.broadcast %6 : vector<1x192xf32> to vector<64x192xf32>
    %8 = arith.addf %5, %7 : vector<64x192xf32>
    %c0_6 = arith.constant 0 : index
    %c0_7 = arith.constant 0 : index
    %9 = vector.load %arg10[%c0_6, %c0_7] : memref<64x192xf32, #tpu.memory_space<vmem>>, vector<64x192xf32>
    tpu.vector_store %arg10[%c0_6, %c0_7], %8 {strides = array<i32>} : memref<64x192xf32, #tpu.memory_space<vmem>>, vector<64x192xf32>,
    %c0_8 = arith.constant 0 : index
    %c0_9 = arith.constant 0 : index
    %10 = vector.load %arg3[%c0_8, %c0_9] : memref<64x192xf32, #tpu.memory_space<vmem>>, vector<64x192xf32>
    %c0_10 = arith.constant 0 : index
    %c0_11 = arith.constant 0 : index
    %11 = vector.load %arg5[%c0_10, %c0_11] : memref<1x64xf32, #tpu.memory_space<vmem>>, vector<1x64xf32>
    %12 = vector.shape_cast %11 : vector<1x64xf32> to vector<1x64xf32>
    %13 = vector.broadcast %12 : vector<1x64xf32> to vector<8x64xf32>
    %c0_12 = arith.constant 0 : index
    %c0_13 = arith.constant 0 : index
    %14 = vector.load %arg9[%c0_12, %c0_13] : memref<8x64xf32, #tpu.memory_space<vmem>>, vector<8x64xf32>
    %c0_i32_14 = arith.constant 0 : i32
    %c8_i32 = arith.constant 8 : i32
    %15 = arith.muli %c0_i32_14, %c8_i32 : i32
    %16 = tpu.assume_multiple %15, 8 : i32
    %17 = arith.index_cast %16 : i32 to index
    %c0_15 = arith.constant 0 : index
    %18 = vector.load %arg10[%17, %c0_15] : memref<64x192xf32, #tpu.memory_space<vmem>>, vector<8x192xf32>
    %cst_16 = arith.constant dense<0.000000e+00> : vector<8x192xf32>
    %19 = tpu.matmul %14, %10, %cst_16 {dimension_numbers = #tpu.dot_dimension_numbers<[1], [0], [0], [1], [0, 0, 1, 1], [], []>} : vector<8x64xf32>, vector<64x192xf32>, vector<8x192xf32> -> vector<8x192xf32>
    %20 = vector.extract_strided_slice %18 {offsets = [0, 0], sizes = [8, 128], strides = [1, 1]} : vector<8x192xf32> to vector<8x128xf32>
    %21 = vector.extract_strided_slice %19 {offsets = [0, 0], sizes = [8, 128], strides = [1, 1]} : vector<8x192xf32> to vector<8x128xf32>
    %22 = arith.addf %20, %21 : vector<8x128xf32>
    %23 = arith.negf %22 : vector<8x128xf32>
    %24 = math.exp %23 : vector<8x128xf32>
    %cst_17 = arith.constant 1.000000e+00 : f32
    %25 = vector.broadcast %cst_17 : f32 to vector<8x128xf32>
    %26 = arith.addf %25, %24 : vector<8x128xf32>
    %27 = arith.divf %25, %26 : vector<8x128xf32>
    %28 = vector.extract_strided_slice %27 {offsets = [0, 0], sizes = [8, 64], strides = [1, 1]} : vector<8x128xf32> to vector<8x64xf32>
    %29 = vector.extract_strided_slice %27 {offsets = [0, 64], sizes = [8, 64], strides = [1, 1]} : vector<8x128xf32> to vector<8x64xf32>
    %30 = vector.extract_strided_slice %18 {offsets = [0, 128], sizes = [8, 64], strides = [1, 1]} : vector<8x192xf32> to vector<8x64xf32>
    %31 = vector.extract_strided_slice %19 {offsets = [0, 128], sizes = [8, 64], strides = [1, 1]} : vector<8x192xf32> to vector<8x64xf32>
    %32 = arith.addf %31, %13 : vector<8x64xf32>
    %33 = arith.mulf %28, %32 : vector<8x64xf32>
    %34 = arith.addf %30, %33 : vector<8x64xf32>
    %35 = math.tanh %34 : vector<8x64xf32>
    %36 = arith.subf %14, %35 : vector<8x64xf32>
    %37 = arith.mulf %29, %36 : vector<8x64xf32>
    %38 = arith.addf %35, %37 : vector<8x64xf32>
    %c1_i32 = arith.constant 1 : i32
    %c8_i32_18 = arith.constant 8 : i32
    %39 = arith.muli %c1_i32, %c8_i32_18 : i32
    %40 = tpu.assume_multiple %39, 8 : i32
    %41 = arith.index_cast %40 : i32 to index
    %c0_19 = arith.constant 0 : index
    %42 = vector.load %arg10[%41, %c0_19] : memref<64x192xf32, #tpu.memory_space<vmem>>, vector<8x192xf32>
    %cst_20 = arith.constant dense<0.000000e+00> : vector<8x192xf32>
    %43 = tpu.matmul %38, %10, %cst_20 {dimension_numbers = #tpu.dot_dimension_numbers<[1], [0], [0], [1], [0, 0, 1, 1], [], []>} : vector<8x64xf32>, vector<64x192xf32>, vector<8x192xf32> -> vector<8x192xf32>
    %44 = vector.extract_strided_slice %42 {offsets = [0, 0], sizes = [8, 128], strides = [1, 1]} : vector<8x192xf32> to vector<8x128xf32>
    %45 = vector.extract_strided_slice %43 {offsets = [0, 0], sizes = [8, 128], strides = [1, 1]} : vector<8x192xf32> to vector<8x128xf32>
    %46 = arith.addf %44, %45 : vector<8x128xf32>
    %47 = arith.negf %46 : vector<8x128xf32>
    %48 = math.exp %47 : vector<8x128xf32>
    %cst_21 = arith.constant 1.000000e+00 : f32
    %49 = vector.broadcast %cst_21 : f32 to vector<8x128xf32>
    %50 = arith.addf %49, %48 : vector<8x128xf32>
    %51 = arith.divf %49, %50 : vector<8x128xf32>
    %52 = vector.extract_strided_slice %51 {offsets = [0, 0], sizes = [8, 64], strides = [1, 1]} : vector<8x128xf32> to vector<8x64xf32>
    %53 = vector.extract_strided_slice %51 {offsets = [0, 64], sizes = [8, 64], strides = [1, 1]} : vector<8x128xf32> to vector<8x64xf32>
    %54 = vector.extract_strided_slice %42 {offsets = [0, 128], sizes = [8, 64], strides = [1, 1]} : vector<8x192xf32> to vector<8x64xf32>
    %55 = vector.extract_strided_slice %43 {offsets = [0, 128], sizes = [8, 64], strides = [1, 1]} : vector<8x192xf32> to vector<8x64xf32>
    %56 = arith.addf %55, %13 : vector<8x64xf32>
    %57 = arith.mulf %52, %56 : vector<8x64xf32>
    %58 = arith.addf %54, %57 : vector<8x64xf32>
    %59 = math.tanh %58 : vector<8x64xf32>
    %60 = arith.subf %38, %59 : vector<8x64xf32>
    %61 = arith.mulf %53, %60 : vector<8x64xf32>
    %62 = arith.addf %59, %61 : vector<8x64xf32>
    %c2_i32 = arith.constant 2 : i32
    %c8_i32_22 = arith.constant 8 : i32
    %63 = arith.muli %c2_i32, %c8_i32_22 : i32
    %64 = tpu.assume_multiple %63, 8 : i32
    %65 = arith.index_cast %64 : i32 to index
    %c0_23 = arith.constant 0 : index
    %66 = vector.load %arg10[%65, %c0_23] : memref<64x192xf32, #tpu.memory_space<vmem>>, vector<8x192xf32>
    %cst_24 = arith.constant dense<0.000000e+00> : vector<8x192xf32>
    %67 = tpu.matmul %62, %10, %cst_24 {dimension_numbers = #tpu.dot_dimension_numbers<[1], [0], [0], [1], [0, 0, 1, 1], [], []>} : vector<8x64xf32>, vector<64x192xf32>, vector<8x192xf32> -> vector<8x192xf32>
    %68 = vector.extract_strided_slice %66 {offsets = [0, 0], sizes = [8, 128], strides = [1, 1]} : vector<8x192xf32> to vector<8x128xf32>
    %69 = vector.extract_strided_slice %67 {offsets = [0, 0], sizes = [8, 128], strides = [1, 1]} : vector<8x192xf32> to vector<8x128xf32>
    %70 = arith.addf %68, %69 : vector<8x128xf32>
    %71 = arith.negf %70 : vector<8x128xf32>
    %72 = math.exp %71 : vector<8x128xf32>
    %cst_25 = arith.constant 1.000000e+00 : f32
    %73 = vector.broadcast %cst_25 : f32 to vector<8x128xf32>
    %74 = arith.addf %73, %72 : vector<8x128xf32>
    %75 = arith.divf %73, %74 : vector<8x128xf32>
    %76 = vector.extract_strided_slice %75 {offsets = [0, 0], sizes = [8, 64], strides = [1, 1]} : vector<8x128xf32> to vector<8x64xf32>
    %77 = vector.extract_strided_slice %75 {offsets = [0, 64], sizes = [8, 64], strides = [1, 1]} : vector<8x128xf32> to vector<8x64xf32>
    %78 = vector.extract_strided_slice %66 {offsets = [0, 128], sizes = [8, 64], strides = [1, 1]} : vector<8x192xf32> to vector<8x64xf32>
    %79 = vector.extract_strided_slice %67 {offsets = [0, 128], sizes = [8, 64], strides = [1, 1]} : vector<8x192xf32> to vector<8x64xf32>
    %80 = arith.addf %79, %13 : vector<8x64xf32>
    %81 = arith.mulf %76, %80 : vector<8x64xf32>
    %82 = arith.addf %78, %81 : vector<8x64xf32>
    %83 = math.tanh %82 : vector<8x64xf32>
    %84 = arith.subf %62, %83 : vector<8x64xf32>
    %85 = arith.mulf %77, %84 : vector<8x64xf32>
    %86 = arith.addf %83, %85 : vector<8x64xf32>
    %c3_i32 = arith.constant 3 : i32
    %c8_i32_26 = arith.constant 8 : i32
    %87 = arith.muli %c3_i32, %c8_i32_26 : i32
    %88 = tpu.assume_multiple %87, 8 : i32
    %89 = arith.index_cast %88 : i32 to index
    %c0_27 = arith.constant 0 : index
    %90 = vector.load %arg10[%89, %c0_27] : memref<64x192xf32, #tpu.memory_space<vmem>>, vector<8x192xf32>
    %cst_28 = arith.constant dense<0.000000e+00> : vector<8x192xf32>
    %91 = tpu.matmul %86, %10, %cst_28 {dimension_numbers = #tpu.dot_dimension_numbers<[1], [0], [0], [1], [0, 0, 1, 1], [], []>} : vector<8x64xf32>, vector<64x192xf32>, vector<8x192xf32> -> vector<8x192xf32>
    %92 = vector.extract_strided_slice %90 {offsets = [0, 0], sizes = [8, 128], strides = [1, 1]} : vector<8x192xf32> to vector<8x128xf32>
    %93 = vector.extract_strided_slice %91 {offsets = [0, 0], sizes = [8, 128], strides = [1, 1]} : vector<8x192xf32> to vector<8x128xf32>
    %94 = arith.addf %92, %93 : vector<8x128xf32>
    %95 = arith.negf %94 : vector<8x128xf32>
    %96 = math.exp %95 : vector<8x128xf32>
    %cst_29 = arith.constant 1.000000e+00 : f32
    %97 = vector.broadcast %cst_29 : f32 to vector<8x128xf32>
    %98 = arith.addf %97, %96 : vector<8x128xf32>
    %99 = arith.divf %97, %98 : vector<8x128xf32>
    %100 = vector.extract_strided_slice %99 {offsets = [0, 0], sizes = [8, 64], strides = [1, 1]} : vector<8x128xf32> to vector<8x64xf32>
    %101 = vector.extract_strided_slice %99 {offsets = [0, 64], sizes = [8, 64], strides = [1, 1]} : vector<8x128xf32> to vector<8x64xf32>
    %102 = vector.extract_strided_slice %90 {offsets = [0, 128], sizes = [8, 64], strides = [1, 1]} : vector<8x192xf32> to vector<8x64xf32>
    %103 = vector.extract_strided_slice %91 {offsets = [0, 128], sizes = [8, 64], strides = [1, 1]} : vector<8x192xf32> to vector<8x64xf32>
    %104 = arith.addf %103, %13 : vector<8x64xf32>
    %105 = arith.mulf %100, %104 : vector<8x64xf32>
    %106 = arith.addf %102, %105 : vector<8x64xf32>
    %107 = math.tanh %106 : vector<8x64xf32>
    %108 = arith.subf %86, %107 : vector<8x64xf32>
    %109 = arith.mulf %101, %108 : vector<8x64xf32>
    %110 = arith.addf %107, %109 : vector<8x64xf32>
    %c4_i32 = arith.constant 4 : i32
    %c8_i32_30 = arith.constant 8 : i32
    %111 = arith.muli %c4_i32, %c8_i32_30 : i32
    %112 = tpu.assume_multiple %111, 8 : i32
    %113 = arith.index_cast %112 : i32 to index
    %c0_31 = arith.constant 0 : index
    %114 = vector.load %arg10[%113, %c0_31] : memref<64x192xf32, #tpu.memory_space<vmem>>, vector<8x192xf32>
    %cst_32 = arith.constant dense<0.000000e+00> : vector<8x192xf32>
    %115 = tpu.matmul %110, %10, %cst_32 {dimension_numbers = #tpu.dot_dimension_numbers<[1], [0], [0], [1], [0, 0, 1, 1], [], []>} : vector<8x64xf32>, vector<64x192xf32>, vector<8x192xf32> -> vector<8x192xf32>
    %116 = vector.extract_strided_slice %114 {offsets = [0, 0], sizes = [8, 128], strides = [1, 1]} : vector<8x192xf32> to vector<8x128xf32>
    %117 = vector.extract_strided_slice %115 {offsets = [0, 0], sizes = [8, 128], strides = [1, 1]} : vector<8x192xf32> to vector<8x128xf32>
    %118 = arith.addf %116, %117 : vector<8x128xf32>
    %119 = arith.negf %118 : vector<8x128xf32>
    %120 = math.exp %119 : vector<8x128xf32>
    %cst_33 = arith.constant 1.000000e+00 : f32
    %121 = vector.broadcast %cst_33 : f32 to vector<8x128xf32>
    %122 = arith.addf %121, %120 : vector<8x128xf32>
    %123 = arith.divf %121, %122 : vector<8x128xf32>
    %124 = vector.extract_strided_slice %123 {offsets = [0, 0], sizes = [8, 64], strides = [1, 1]} : vector<8x128xf32> to vector<8x64xf32>
    %125 = vector.extract_strided_slice %123 {offsets = [0, 64], sizes = [8, 64], strides = [1, 1]} : vector<8x128xf32> to vector<8x64xf32>
    %126 = vector.extract_strided_slice %114 {offsets = [0, 128], sizes = [8, 64], strides = [1, 1]} : vector<8x192xf32> to vector<8x64xf32>
    %127 = vector.extract_strided_slice %115 {offsets = [0, 128], sizes = [8, 64], strides = [1, 1]} : vector<8x192xf32> to vector<8x64xf32>
    %128 = arith.addf %127, %13 : vector<8x64xf32>
    %129 = arith.mulf %124, %128 : vector<8x64xf32>
    %130 = arith.addf %126, %129 : vector<8x64xf32>
    %131 = math.tanh %130 : vector<8x64xf32>
    %132 = arith.subf %110, %131 : vector<8x64xf32>
    %133 = arith.mulf %125, %132 : vector<8x64xf32>
    %134 = arith.addf %131, %133 : vector<8x64xf32>
    %c5_i32 = arith.constant 5 : i32
    %c8_i32_34 = arith.constant 8 : i32
    %135 = arith.muli %c5_i32, %c8_i32_34 : i32
    %136 = tpu.assume_multiple %135, 8 : i32
    %137 = arith.index_cast %136 : i32 to index
    %c0_35 = arith.constant 0 : index
    %138 = vector.load %arg10[%137, %c0_35] : memref<64x192xf32, #tpu.memory_space<vmem>>, vector<8x192xf32>
    %cst_36 = arith.constant dense<0.000000e+00> : vector<8x192xf32>
    %139 = tpu.matmul %134, %10, %cst_36 {dimension_numbers = #tpu.dot_dimension_numbers<[1], [0], [0], [1], [0, 0, 1, 1], [], []>} : vector<8x64xf32>, vector<64x192xf32>, vector<8x192xf32> -> vector<8x192xf32>
    %140 = vector.extract_strided_slice %138 {offsets = [0, 0], sizes = [8, 128], strides = [1, 1]} : vector<8x192xf32> to vector<8x128xf32>
    %141 = vector.extract_strided_slice %139 {offsets = [0, 0], sizes = [8, 128], strides = [1, 1]} : vector<8x192xf32> to vector<8x128xf32>
    %142 = arith.addf %140, %141 : vector<8x128xf32>
    %143 = arith.negf %142 : vector<8x128xf32>
    %144 = math.exp %143 : vector<8x128xf32>
    %cst_37 = arith.constant 1.000000e+00 : f32
    %145 = vector.broadcast %cst_37 : f32 to vector<8x128xf32>
    %146 = arith.addf %145, %144 : vector<8x128xf32>
    %147 = arith.divf %145, %146 : vector<8x128xf32>
    %148 = vector.extract_strided_slice %147 {offsets = [0, 0], sizes = [8, 64], strides = [1, 1]} : vector<8x128xf32> to vector<8x64xf32>
    %149 = vector.extract_strided_slice %147 {offsets = [0, 64], sizes = [8, 64], strides = [1, 1]} : vector<8x128xf32> to vector<8x64xf32>
    %150 = vector.extract_strided_slice %138 {offsets = [0, 128], sizes = [8, 64], strides = [1, 1]} : vector<8x192xf32> to vector<8x64xf32>
    %151 = vector.extract_strided_slice %139 {offsets = [0, 128], sizes = [8, 64], strides = [1, 1]} : vector<8x192xf32> to vector<8x64xf32>
    %152 = arith.addf %151, %13 : vector<8x64xf32>
    %153 = arith.mulf %148, %152 : vector<8x64xf32>
    %154 = arith.addf %150, %153 : vector<8x64xf32>
    %155 = math.tanh %154 : vector<8x64xf32>
    %156 = arith.subf %134, %155 : vector<8x64xf32>
    %157 = arith.mulf %149, %156 : vector<8x64xf32>
    %158 = arith.addf %155, %157 : vector<8x64xf32>
    %c6_i32 = arith.constant 6 : i32
    %c8_i32_38 = arith.constant 8 : i32
    %159 = arith.muli %c6_i32, %c8_i32_38 : i32
    %160 = tpu.assume_multiple %159, 8 : i32
    %161 = arith.index_cast %160 : i32 to index
    %c0_39 = arith.constant 0 : index
    %162 = vector.load %arg10[%161, %c0_39] : memref<64x192xf32, #tpu.memory_space<vmem>>, vector<8x192xf32>
    %cst_40 = arith.constant dense<0.000000e+00> : vector<8x192xf32>
    %163 = tpu.matmul %158, %10, %cst_40 {dimension_numbers = #tpu.dot_dimension_numbers<[1], [0], [0], [1], [0, 0, 1, 1], [], []>} : vector<8x64xf32>, vector<64x192xf32>, vector<8x192xf32> -> vector<8x192xf32>
    %164 = vector.extract_strided_slice %162 {offsets = [0, 0], sizes = [8, 128], strides = [1, 1]} : vector<8x192xf32> to vector<8x128xf32>
    %165 = vector.extract_strided_slice %163 {offsets = [0, 0], sizes = [8, 128], strides = [1, 1]} : vector<8x192xf32> to vector<8x128xf32>
    %166 = arith.addf %164, %165 : vector<8x128xf32>
    %167 = arith.negf %166 : vector<8x128xf32>
    %168 = math.exp %167 : vector<8x128xf32>
    %cst_41 = arith.constant 1.000000e+00 : f32
    %169 = vector.broadcast %cst_41 : f32 to vector<8x128xf32>
    %170 = arith.addf %169, %168 : vector<8x128xf32>
    %171 = arith.divf %169, %170 : vector<8x128xf32>
    %172 = vector.extract_strided_slice %171 {offsets = [0, 0], sizes = [8, 64], strides = [1, 1]} : vector<8x128xf32> to vector<8x64xf32>
    %173 = vector.extract_strided_slice %171 {offsets = [0, 64], sizes = [8, 64], strides = [1, 1]} : vector<8x128xf32> to vector<8x64xf32>
    %174 = vector.extract_strided_slice %162 {offsets = [0, 128], sizes = [8, 64], strides = [1, 1]} : vector<8x192xf32> to vector<8x64xf32>
    %175 = vector.extract_strided_slice %163 {offsets = [0, 128], sizes = [8, 64], strides = [1, 1]} : vector<8x192xf32> to vector<8x64xf32>
    %176 = arith.addf %175, %13 : vector<8x64xf32>
    %177 = arith.mulf %172, %176 : vector<8x64xf32>
    %178 = arith.addf %174, %177 : vector<8x64xf32>
    %179 = math.tanh %178 : vector<8x64xf32>
    %180 = arith.subf %158, %179 : vector<8x64xf32>
    %181 = arith.mulf %173, %180 : vector<8x64xf32>
    %182 = arith.addf %179, %181 : vector<8x64xf32>
    %c7_i32 = arith.constant 7 : i32
    %c8_i32_42 = arith.constant 8 : i32
    %183 = arith.muli %c7_i32, %c8_i32_42 : i32
    %184 = tpu.assume_multiple %183, 8 : i32
    %185 = arith.index_cast %184 : i32 to index
    %c0_43 = arith.constant 0 : index
    %186 = vector.load %arg10[%185, %c0_43] : memref<64x192xf32, #tpu.memory_space<vmem>>, vector<8x192xf32>
    %cst_44 = arith.constant dense<0.000000e+00> : vector<8x192xf32>
    %187 = tpu.matmul %182, %10, %cst_44 {dimension_numbers = #tpu.dot_dimension_numbers<[1], [0], [0], [1], [0, 0, 1, 1], [], []>} : vector<8x64xf32>, vector<64x192xf32>, vector<8x192xf32> -> vector<8x192xf32>
    %188 = vector.extract_strided_slice %186 {offsets = [0, 0], sizes = [8, 128], strides = [1, 1]} : vector<8x192xf32> to vector<8x128xf32>
    %189 = vector.extract_strided_slice %187 {offsets = [0, 0], sizes = [8, 128], strides = [1, 1]} : vector<8x192xf32> to vector<8x128xf32>
    %190 = arith.addf %188, %189 : vector<8x128xf32>
    %191 = arith.negf %190 : vector<8x128xf32>
    %192 = math.exp %191 : vector<8x128xf32>
    %cst_45 = arith.constant 1.000000e+00 : f32
    %193 = vector.broadcast %cst_45 : f32 to vector<8x128xf32>
    %194 = arith.addf %193, %192 : vector<8x128xf32>
    %195 = arith.divf %193, %194 : vector<8x128xf32>
    %196 = vector.extract_strided_slice %195 {offsets = [0, 0], sizes = [8, 64], strides = [1, 1]} : vector<8x128xf32> to vector<8x64xf32>
    %197 = vector.extract_strided_slice %195 {offsets = [0, 64], sizes = [8, 64], strides = [1, 1]} : vector<8x128xf32> to vector<8x64xf32>
    %198 = vector.extract_strided_slice %186 {offsets = [0, 128], sizes = [8, 64], strides = [1, 1]} : vector<8x192xf32> to vector<8x64xf32>
    %199 = vector.extract_strided_slice %187 {offsets = [0, 128], sizes = [8, 64], strides = [1, 1]} : vector<8x192xf32> to vector<8x64xf32>
    %200 = arith.addf %199, %13 : vector<8x64xf32>
    %201 = arith.mulf %196, %200 : vector<8x64xf32>
    %202 = arith.addf %198, %201 : vector<8x64xf32>
    %203 = math.tanh %202 : vector<8x64xf32>
    %204 = arith.subf %182, %203 : vector<8x64xf32>
    %205 = arith.mulf %197, %204 : vector<8x64xf32>
    %206 = arith.addf %203, %205 : vector<8x64xf32>
    %c8_i32_46 = arith.constant 8 : i32
    %c0_47 = arith.constant 0 : index
    %c0_48 = arith.constant 0 : index
    %207 = vector.load %arg9[%c0_47, %c0_48] : memref<8x64xf32, #tpu.memory_space<vmem>>, vector<8x64xf32>
    tpu.vector_store %arg9[%c0_47, %c0_48], %206 {strides = array<i32>} : memref<8x64xf32, #tpu.memory_space<vmem>>, vector<8x64xf32>,
    %c0_i32_49 = arith.constant 0 : i32
    %208 = arith.cmpi eq, %arg0, %c0_i32_49 : i32
    %209 = arith.extui %208 : i1 to i32
    %c0_i32_50 = arith.constant 0 : i32
    %210 = arith.cmpi ne, %209, %c0_i32_50 : i32
    scf.if %210 {
      %c0_51 = arith.constant 0 : index
      %c0_52 = arith.constant 0 : index
      %211 = vector.load %arg6[%c0_51, %c0_52] : memref<64x2xf32, #tpu.memory_space<vmem>>, vector<64x2xf32>
      %cst_53 = arith.constant dense<0.000000e+00> : vector<8x2xf32>
      %212 = tpu.matmul %206, %211, %cst_53 {dimension_numbers = #tpu.dot_dimension_numbers<[1], [0], [0], [1], [0, 0, 1, 1], [], []>} : vector<8x64xf32>, vector<64x2xf32>, vector<8x2xf32> -> vector<8x2xf32>
      %c0_54 = arith.constant 0 : index
      %c0_55 = arith.constant 0 : index
      %213 = vector.load %arg7[%c0_54, %c0_55] : memref<1x2xf32, #tpu.memory_space<vmem>>, vector<1x2xf32>
      %214 = vector.broadcast %213 : vector<1x2xf32> to vector<8x2xf32>
      %215 = arith.addf %212, %214 : vector<8x2xf32>
      %c0_56 = arith.constant 0 : index
      %c0_57 = arith.constant 0 : index
      %216 = vector.load %arg8[%c0_56, %c0_57] : memref<8x2xf32, #tpu.memory_space<vmem>>, vector<8x2xf32>
      tpu.vector_store %arg8[%c0_56, %c0_57], %215 {strides = array<i32>} : memref<8x2xf32, #tpu.memory_space<vmem>>, vector<8x2xf32>,
    } else {
    }
    return
  }
  func.func @transform_0(%arg0: i32) -> (i32, i32) {
    %c0_i32 = arith.constant 0 : i32
    %c0_i32_0 = arith.constant 0 : i32
    return %arg0, %c0_i32 : i32, i32
  }
  func.func @transform_1(%arg0: i32) -> (i32, i32) {
    %c0_i32 = arith.constant 0 : i32
    %c0_i32_0 = arith.constant 0 : i32
    %c0_i32_1 = arith.constant 0 : i32
    return %c0_i32, %c0_i32_0 : i32, i32
  }
  func.func @transform_2(%arg0: i32) -> (i32, i32) {
    %c0_i32 = arith.constant 0 : i32
    %c0_i32_0 = arith.constant 0 : i32
    %c0_i32_1 = arith.constant 0 : i32
    return %c0_i32, %c0_i32_0 : i32, i32
  }
  func.func @transform_3(%arg0: i32) -> (i32, i32) {
    %c0_i32 = arith.constant 0 : i32
    %c0_i32_0 = arith.constant 0 : i32
    %c0_i32_1 = arith.constant 0 : i32
    return %c0_i32, %c0_i32_0 : i32, i32
  }
  func.func @transform_4(%arg0: i32) -> (i32, i32) {
    %c0_i32 = arith.constant 0 : i32
    %c0_i32_0 = arith.constant 0 : i32
    %c0_i32_1 = arith.constant 0 : i32
    return %c0_i32, %c0_i32_0 : i32, i32
  }
  func.func @transform_5(%arg0: i32) -> (i32, i32) {
    %c0_i32 = arith.constant 0 : i32
    %c0_i32_0 = arith.constant 0 : i32
    %c0_i32_1 = arith.constant 0 : i32
    return %c0_i32, %c0_i32_0 : i32, i32
  }
  func.func @transform_6(%arg0: i32) -> (i32, i32) {
    %c0_i32 = arith.constant 0 : i32
    %c0_i32_0 = arith.constant 0 : i32
    %c0_i32_1 = arith.constant 0 : i32
    return %c0_i32, %c0_i32_0 : i32, i32
  }
  func.func @transform_7(%arg0: i32) -> (i32, i32) {
    %c0_i32 = arith.constant 0 : i32
    %c0_i32_0 = arith.constant 0 : i32
    %c0_i32_1 = arith.constant 0 : i32
    return %c0_i32, %c0_i32_0 : i32, i32
  }
}

</mosaic_0001>

<bundles_post_ra>
// kernel: gru_test_forward.1
= control target key start
LH: loop header
LB: loop body
LE: loop exit
PB: predicated region body
PF: predicated region fallthrough
CT: control target
= control target key end

     0   :  { %vm30_vm0 = vcmask 523264   ;;  %v1254_v3 = vmov 0.0   ;;  %vm56_vm1 = vcmask 130048   ;;  %v46_v23 = vlaneseq  ;;  %s1695_s1 = inlined_call_operand.vmem [shape: f32[16,192], index: 1, kind: input, shape index: {}]   ;;  %s1696_s2 = inlined_call_operand.vmem [shape: f32[64,192], index: 2, kind: input, shape index: {}]   ;;  %s1697_s0 = inlined_call_operand.vmem [shape: f32[64,16], index: 0, kind: input, shape index: {}]   ;;  %s1698_s3 = inlined_call_operand.vmem [shape: f32[1,192], index: 3, kind: input, shape index: {}]   ;;  %s1699_s4 = inlined_call_operand.vmem [shape: f32[1,64], index: 4, kind: input, shape index: {}]   ;;  %s1700_s5 = inlined_call_operand.vmem [shape: f32[64,2], index: 5, kind: input, shape index: {}]   ;;  %s1701_s6 = inlined_call_operand.vmem [shape: f32[1,2], index: 6, kind: input, shape index: {}]   ;;  %s1702_s7 = inlined_call_operand.vmem [shape: f32[8,2], index: 7, kind: output, shape index: {}]  }
   0x1   :  { %v43_v0 = vld [vmem:[%s1695_s1 + $0x18] sm:$0xff]  ;;  %v42_v2 = vld [vmem:[%s1695_s1 + $0x10] sm:$0xff]  ;;  %145 = vmatprep.mubr.f32.mxu0 %v1254_v3  ;;  %307 = vmatprep.mubr.f32.mxu1 %v1254_v3  ;;  %31 = vst.msk [vmem:[#allocation2] sm:$0xff] %vm30_vm0, %v1254_v3  ;;  %v41_v5 = vld [vmem:[%s1695_s1 + $0x8] sm:$0xff]  ;;  %vm1256_vm2 = vmmov 0   ;;  %vm1135_vm3 = vcmask 15360  }
   0x2   :  { %v1303_v1 = vld [vmem:[%s1696_s2 + $0x78] sm:$0xff]  ;;  %109 = vmatprep.subr.mxu0 %v43_v0  ;;  %v1316_v4 = vld [vmem:[%s1696_s2 + $0x70] sm:$0xff]  ;;  %v1324_v6 = vld [vmem:[%s1696_s2 + $0x68] sm:$0xff]  ;;  %v47_v24 = vshrl.u32 %v46_v23, 7 }
   0x3   :  { %259 = vmatprep.subr.mxu1 %v1303_v1  ;;  %110 = vmatpush1.msra.mxu0 %v42_v2  ;;  %v40_v7 = vld [vmem:[%s1695_s1] sm:$0xff]  ;;  %v1342_v10 = vld [vmem:[%s1696_s2 + $0x58] sm:$0xff]  ;;  %v1347_v11 = vld [vmem:[%s1696_s2 + $0x50] sm:$0xff] }
   0x4   :  { %260 = vmatpush1.msra.mxu1 %v1316_v4  ;;  %v1333_v8 = vld [vmem:[%s1696_s2 + $0x60] sm:$0xff]  ;;  %111 = vmatprep.subr.mxu0 %v41_v5  ;;  %v1353_v12 = vld [vmem:[%s1696_s2 + $0x48] sm:$0xff]  ;;  %v1366_v14 = vld [vmem:[%s1696_s2 + $0x38] sm:$0xff]  ;;  %v48_v25 = vsub.s32 0, %v47_v24  ;;  %v52_v27 = vsub.s32 1, %v47_v24 }
   0x5   :  { %v32_v9 = vld [vmem:[%s1697_s0] sm:$0xff]  ;;  %261 = vmatprep.subr.mxu1 %v1324_v6  ;;  %112 = vmatpush1.msra.mxu0 %v40_v7  ;;  %v1373_v15 = vld [vmem:[%s1696_s2 + $0x30] sm:$0xff]  ;;  %v1380_v16 = vld [vmem:[%s1696_s2 + $0x28] sm:$0xff] }
   0x6   :  { %262 = vmatpush1.msra.mxu1 %v1333_v8  ;;  %1148 = vmatmul.mubr.msk.f32.vlgmr.msra.gmra.mxu0 %vm56_vm1, %v32_v9  ;;  %v1360_v13 = vld [vmem:[%s1696_s2 + $0x40] sm:$0xff]  ;;  %v1394_v18 = vld [vmem:[%s1696_s2 + $0x18] sm:$0xff]  ;;  %v1401_v19 = vld [vmem:[%s1696_s2 + $0x10] sm:$0xff] }
   0x7   :  { %263 = vmatprep.subr.mxu1 %v1342_v10  ;;  %151 = vmatprep.mubr.f32.mxu0 %v1254_v3  ;;  %v1387_v17 = vld [vmem:[%s1696_s2 + $0x20] sm:$0xff]  ;;  %v1408_v20 = vld [vmem:[%s1696_s2 + $0x8] sm:$0xff]  ;;  %v34_v9 = vld [vmem:[%s1697_s0 + $0x10] sm:$0xff] }
   0x8   :  { %264 = vmatpush1.msra.mxu1 %v1347_v11  ;;  %461 = vmatprep.subr.mxu0 %v1303_v1  ;;  %v1415_v21 = vld [vmem:[%s1696_s2] sm:$0xff]  ;;  %v33_v46 = vld [vmem:[%s1697_s0 + $0x8] sm:$0xff] }
   0x9   :  { %265 = vmatprep.subr.mxu1 %v1353_v12  ;;  %462 = vmatpush1.msra.mxu0 %v1316_v4  ;;  %v1419_v22 = vld [vmem:[#allocation2] sm:$0xff] }
   0xa   :  { %266 = vmatpush1.msra.mxu1 %v1360_v13  ;;  %463 = vmatprep.subr.mxu0 %v1324_v6  ;;  %v44_v26 = vld [vmem:[%s1698_s3] sm:$0x3] }
   0xb   :  { %267 = vmatprep.subr.mxu1 %v1366_v14  ;;  %464 = vmatpush1.msra.mxu0 %v1333_v8  ;;  %v1456_v28 = vrot.slane %v44_v26, %v48_v25  ;;  %v1458_v29 = vrot.slane %v44_v26, %v52_v27  ;;  %v1466_v39 = vld [vmem:[%s1699_s4] ss:$0 sm:$0xff]  ;;  %s1255_s4 = smov 64   ;;  %v37_v26 = vld [vmem:[%s1697_s0 + $0x28] sm:$0xff]  ;;  %v38_v27 = vld [vmem:[%s1697_s0 + $0x30] sm:$0xff] }
   0xc   :  { %268 = vmatpush1.msra.mxu1 %v1373_v15  ;;  %465 = vmatprep.subr.mxu0 %v1342_v10  ;;  %v36_v23 = vld [vmem:[%s1697_s0 + $0x20] sm:$0xff] }
   0xd   :  { %269 = vmatprep.subr.mxu1 %v1380_v16  ;;  %466 = vmatpush1.msra.mxu0 %v1347_v11 }
   0xe   :  { %270 = vmatpush1.msra.mxu1 %v1387_v17  ;;  %467 = vmatprep.subr.mxu0 %v1353_v12 }
   0xf   :  { %271 = vmatprep.subr.mxu1 %v1394_v18  ;;  %468 = vmatpush1.msra.mxu0 %v1360_v13 }
  0x10   :  { %272 = vmatpush1.msra.mxu1 %v1401_v19  ;;  %469 = vmatprep.subr.mxu0 %v1366_v14 }
  0x11   :  { %273 = vmatprep.subr.mxu1 %v1408_v20  ;;  %470 = vmatpush1.msra.mxu0 %v1373_v15 }
  0x12   :  { %274 = vmatpush1.msra.mxu1 %v1415_v21  ;;  %471 = vmatprep.subr.mxu0 %v1380_v16 }
  0x13   :  { %1157 = vmatmul.mubr.msk.f32.vlgmr.msra.gmra.mxu1 %vm30_vm0, %v1419_v22  ;;  %360 = vmatprep.subr.mxu1 %v1303_v1 }
  0x14   :  { %361 = vmatpush1.msra.mxu1 %v1316_v4  ;;  %408 = vmatprep.mubr.f32.mxu1 %v1254_v3 }
  0x15   :  { %362 = vmatprep.subr.mxu1 %v1324_v6  ;;  %472 = vmatpush1.msra.mxu0 %v1387_v17 }
  0x16   :  { %363 = vmatpush1.msra.mxu1 %v1333_v8  ;;  %473 = vmatprep.subr.mxu0 %v1394_v18 }
  0x17   :  { %364 = vmatprep.subr.mxu1 %v1342_v10  ;;  %474 = vmatpush1.msra.mxu0 %v1401_v19 }
  0x18   :  { %365 = vmatpush1.msra.mxu1 %v1347_v11  ;;  %475 = vmatprep.subr.mxu0 %v1408_v20 }
  0x19   :  { %366 = vmatprep.subr.mxu1 %v1353_v12  ;;  %476 = vmatpush1.msra.mxu0 %v1415_v21 }
  0x1a   :  { %367 = vmatpush1.msra.mxu1 %v1360_v13  ;;  %663 = vmatprep.subr.mxu0 %v1303_v1 }
  0x1b   :  { %368 = vmatprep.subr.mxu1 %v1366_v14  ;;  %1149 = vmatmul.mubr.msk.f32.gmra.mxu0 %vm56_vm1, %v33_v46 }
  0x1c   :  { %369 = vmatpush1.msra.mxu1 %v1373_v15  ;;  %157 = vmatprep.mubr.f32.mxu0 %v1254_v3 }
  0x1d   :  { %370 = vmatprep.subr.mxu1 %v1380_v16 }
  0x1e   :  { %371 = vmatpush1.msra.mxu1 %v1387_v17 }
  0x1f   :  { %372 = vmatprep.subr.mxu1 %v1394_v18  ;;  %1150 = vmatmul.mubr.msk.f32.gmra.mxu0 %vm56_vm1, %v34_v9 }
  0x20   :  { %373 = vmatpush1.msra.mxu1 %v1401_v19  ;;  %163 = vmatprep.mubr.f32.mxu0 %v1254_v3 }
  0x21   :  { %374 = vmatprep.subr.mxu1 %v1408_v20 }
  0x22   :  { %375 = vmatpush1.msra.mxu1 %v1415_v21 }
  0x23   :  { %562 = vmatprep.subr.mxu1 %v1303_v1 }
  0xc6   :  { %v147_v30 = vpop.f32.mrf.mxu0 }
  0xc7   :  { %v148_v31 = vadd.f32 %v147_v30, %v1456_v28  ;;  %v39_v30 = vld [vmem:[%s1697_s0 + $0x38] sm:$0xff] }
  0xc8   :  { %v149_v32 = vpop.f32.mrf.mxu0 }
  0xc9   :  { %v150_v33 = vadd.f32 %v149_v32, %v1458_v29 }
  0xcb   :  { %196 = vst.msk [vmem:[#allocation3 + $0x8] sm:$0xff] %vm30_vm0, %v150_v33 }
  0xd2   :  { %v239_v44 = vld [vmem:[#allocation3 + $0x8] sm:$0xff] }
  0xd3   :  { %v309_v34 = vpop.f32.mrf.mxu1 }
  0xd4   :  { %v314_v35 = vadd.f32 %v309_v34, %v148_v31 }
  0xd5   :  { %v311_v40 = vpop.f32.mrf.mxu1 }
  0xd6   :  { %v1158_v36 = vmul.f32 -1.442695, %v314_v35  ;;  %v321_v41 = vadd.f32 %v1466_v39, %v311_v40 }
  0xd8   :  { %1206 = vpow2.f32 %v1158_v36 }
  0xdb   :  { %v153_v51 = vpop.f32.mrf.mxu0 }
  0xdc   :  { %v154_v52 = vadd.f32 %v153_v51, %v1456_v28 }
  0xdd   :  { %v155_v53 = vpop.f32.mrf.mxu0 }
  0xde   :  { %v156_v54 = vadd.f32 %v155_v53, %v1458_v29 }
  0xdf   :  { %v159_v33 = vpop.f32.mrf.mxu0 }
  0xe0   :  { %198 = vst.msk [vmem:[#allocation3 + $0x18] sm:$0xff] %vm30_vm0, %v156_v54  ;;  %v160_v34 = vadd.f32 %v159_v33, %v1456_v28 }
  0xe1   :  { %v161_v35 = vpop.f32.mrf.mxu0 }
  0xe2   :  { %v162_v36 = vadd.f32 %v161_v35, %v1458_v29 }
  0xe4   :  { %200 = vst.msk [vmem:[#allocation3 + $0x28] sm:$0xff] %vm30_vm0, %v162_v36 }
  0xe5   :  { %v1207_v37 = vpop.eup %1206 }
  0xe6   :  { %v318_v38 = vadd.f32 1.0, %v1207_v37 }
  0xe7   :  { %v340_v5 = vld [vmem:[#allocation3 + $0x18] sm:$0xff] }
  0xe8   :  { %1208 = vrcp.f32 %v318_v38 }
  0xf5   :  { %v1209_v42 = vpop.eup %1208 }
  0xf6   :  { %v322_v43 = vmul.f32 %v1209_v42, %v321_v41 }
  0xf8   :  { %v323_v45 = vadd.f32 %v322_v43, %v239_v44 }
  0xfa   :  { %1210 = vtanh.f32 %v323_v45 }
 0x107   :  { %v1211_v47 = vpop.eup %1210 }
 0x108   :  { %v325_v48 = vsub.f32 %v1419_v22, %v1211_v47  ;;  %v35_v22 = vld [vmem:[%s1697_s0 + $0x18] sm:$0xff] }
 0x109   :  { %1151 = vmatmul.mubr.msk.f32.gmra.mxu0 %vm56_vm1, %v35_v22 }
 0x10a   :  { %327 = vrot.lane.b32.xlu0 %v325_v48, %s1255_s4  ;;  %169 = vmatprep.mubr.f32.mxu0 %v1254_v3 }
 0x10d   :  { %1152 = vmatmul.mubr.msk.f32.gmra.mxu0 %vm56_vm1, %v36_v23 }
 0x10e   :  { %175 = vmatprep.mubr.f32.mxu0 %v1254_v3 }
 0x111   :  { %1153 = vmatmul.mubr.msk.f32.gmra.mxu0 %vm56_vm1, %v37_v26 }
 0x112   :  { %181 = vmatprep.mubr.f32.mxu0 %v1254_v3 }
 0x115   :  { %1154 = vmatmul.mubr.msk.f32.gmra.mxu0 %vm56_vm1, %v38_v27 }
 0x116   :  { %187 = vmatprep.mubr.f32.mxu0 %v1254_v3 }
 0x119   :  { %1155 = vmatmul.mubr.msk.f32.gmra.mxu0 %vm56_vm1, %v39_v30 }
 0x11a   :  { %509 = vmatprep.mubr.f32.mxu0 %v1254_v3 }
 0x17c   :  { %v328_v49 = vpop.permute.xlu0 %327 }
 0x17d   :  { %v330_v50 = vmul.f32 %v1209_v42, %v328_v49 }
 0x17f   :  { %332 = vrot.lane.b32.xlu0 %v330_v50, %s1255_s4 }
 0x1c9   :  { %v165_v37 = vpop.f32.mrf.mxu0 }
 0x1ca   :  { %v1535_v38 = vadd.f32 %v165_v37, %v1456_v28 }
 0x1cb   :  { %v167_v40 = vpop.f32.mrf.mxu0 }
 0x1cc   :  { %v168_v41 = vadd.f32 %v167_v40, %v1458_v29 }
 0x1cd   :  { %v171_v42 = vpop.f32.mrf.mxu0 }
 0x1ce   :  { %202 = vst.msk [vmem:[#allocation3 + $0x38] sm:$0xff] %vm30_vm0, %v168_v41  ;;  %v1540_v43 = vadd.f32 %v171_v42, %v1456_v28 }
 0x1cf   :  { %v173_v44 = vpop.f32.mrf.mxu0 }
 0x1d0   :  { %v174_v45 = vadd.f32 %v173_v44, %v1458_v29 }
 0x1d1   :  { %v177_v46 = vpop.f32.mrf.mxu0 }
 0x1d2   :  { %204 = vst.msk [vmem:[#allocation3 + $0x48] sm:$0xff] %vm30_vm0, %v174_v45 }
 0x1d3   :  { %v179_v48 = vpop.f32.mrf.mxu0 }
 0x1d4   :  { %v180_v49 = vadd.f32 %v179_v48, %v1458_v29 }
 0x1d5   :  { %v183_v50 = vpop.f32.mrf.mxu0  ;;  %v542_v41 = vld [vmem:[#allocation3 + $0x38] sm:$0xff] }
 0x1d6   :  { %206 = vst.msk [vmem:[#allocation3 + $0x58] sm:$0xff] %vm30_vm0, %v180_v49  ;;  %v1550_v51 = vadd.f32 %v183_v50, %v1456_v28 }
 0x1f1   :  { %v333_v55 = vpop.permute.xlu0 %332 }
 0x1f2   :  { %v335_v56 = vadd.f32 %v1211_v47, %v333_v55  ;;  %v1545_v47 = vadd.f32 %v177_v46, %v1456_v28 }
 0x1f4   :  { %1159 = vmatmul.mubr.msk.f32.vlgmr.msra.gmra.mxu1 %vm30_vm0, %v335_v56 }
 0x1f5   :  { %563 = vmatpush1.msra.mxu1 %v1316_v4  ;;  %610 = vmatprep.mubr.f32.mxu1 %v1254_v3 }
 0x1f6   :  { %564 = vmatprep.subr.mxu1 %v1324_v6 }
 0x1f7   :  { %565 = vmatpush1.msra.mxu1 %v1333_v8 }
 0x1f8   :  { %566 = vmatprep.subr.mxu1 %v1342_v10 }
 0x1f9   :  { %567 = vmatpush1.msra.mxu1 %v1347_v11 }
 0x1fa   :  { %568 = vmatprep.subr.mxu1 %v1353_v12 }
 0x1fb   :  { %569 = vmatpush1.msra.mxu1 %v1360_v13 }
 0x1fc   :  { %570 = vmatprep.subr.mxu1 %v1366_v14 }
 0x1fd   :  { %571 = vmatpush1.msra.mxu1 %v1373_v15 }
 0x1fe   :  { %572 = vmatprep.subr.mxu1 %v1380_v16 }
 0x1ff   :  { %573 = vmatpush1.msra.mxu1 %v1387_v17 }
 0x200   :  { %574 = vmatprep.subr.mxu1 %v1394_v18 }
 0x201   :  { %575 = vmatpush1.msra.mxu1 %v1401_v19 }
 0x202   :  { %576 = vmatprep.subr.mxu1 %v1408_v20 }
 0x203   :  { %577 = vmatpush1.msra.mxu1 %v1415_v21 }
 0x204   :  { %764 = vmatprep.subr.mxu1 %v1303_v1 }
 0x2b4   :  { %v410_v57 = vpop.f32.mrf.mxu1 }
 0x2b5   :  { %v415_v58 = vadd.f32 %v410_v57, %v154_v52  ;;  %v185_v52 = vpop.f32.mrf.mxu0 }
 0x2b6   :  { %v412_v62 = vpop.f32.mrf.mxu1  ;;  %v186_v53 = vadd.f32 %v185_v52, %v1458_v29 }
 0x2b7   :  { %v1160_v59 = vmul.f32 -1.442695, %v415_v58  ;;  %v422_v63 = vadd.f32 %v1466_v39, %v412_v62  ;;  %v189_v54 = vpop.f32.mrf.mxu0 }
 0x2b8   :  { %208 = vst.msk [vmem:[#allocation3 + $0x68] sm:$0xff] %vm30_vm0, %v186_v53  ;;  %v1555_v55 = vadd.f32 %v189_v54, %v1456_v28 }
 0x2b9   :  { %1212 = vpow2.f32 %v1160_v59 }
 0x2c6   :  { %v1213_v60 = vpop.eup %1212 }
 0x2c7   :  { %v419_v61 = vadd.f32 1.0, %v1213_v60 }
 0x2c9   :  { %1214 = vrcp.f32 %v419_v61 }
 0x2d6   :  { %v1215_v0 = vpop.eup %1214 }
 0x2d7   :  { %v423_v2 = vmul.f32 %v1215_v0, %v422_v63 }
 0x2d9   :  { %v424_v7 = vadd.f32 %v423_v2, %v340_v5 }
 0x2db   :  { %1216 = vtanh.f32 %v424_v7  ;;  %v441_v7 = vld [vmem:[#allocation3 + $0x28] sm:$0xff] }
 0x2e8   :  { %v1217_v24 = vpop.eup %1216 }
 0x2e9   :  { %v426_v25 = vsub.f32 %v335_v56, %v1217_v24  ;;  %v191_v56 = vpop.f32.mrf.mxu0 }
 0x2ea   :  { %v192_v57 = vadd.f32 %v191_v56, %v1458_v29 }
 0x2eb   :  { %428 = vrot.lane.b32.xlu1 %v426_v25, %s1255_s4 }
 0x2ec   :  { %210 = vst.msk [vmem:[#allocation3 + $0x78] sm:$0xff] %vm30_vm0, %v192_v57 }
 0x35d   :  { %v429_v31 = vpop.permute.xlu1 %428 }
 0x35e   :  { %v431_v32 = vmul.f32 %v1215_v0, %v429_v31 }
 0x360   :  { %433 = vrot.lane.b32.xlu1 %v431_v32, %s1255_s4 }
 0x3d2   :  { %v434_v58 = vpop.permute.xlu1 %433 }
 0x3d3   :  { %v436_v59 = vadd.f32 %v1217_v24, %v434_v58 }
 0x3d5   :  { %1161 = vmatmul.mubr.msk.f32.vlgmr.msra.gmra.mxu0 %vm30_vm0, %v436_v59 }
 0x3d6   :  { %664 = vmatpush1.msra.mxu0 %v1316_v4  ;;  %711 = vmatprep.mubr.f32.mxu0 %v1254_v3 }
 0x3d7   :  { %665 = vmatprep.subr.mxu0 %v1324_v6 }
 0x3d8   :  { %666 = vmatpush1.msra.mxu0 %v1333_v8 }
 0x3d9   :  { %667 = vmatprep.subr.mxu0 %v1342_v10 }
 0x3da   :  { %668 = vmatpush1.msra.mxu0 %v1347_v11 }
 0x3db   :  { %669 = vmatprep.subr.mxu0 %v1353_v12 }
 0x3dc   :  { %670 = vmatpush1.msra.mxu0 %v1360_v13 }
 0x3dd   :  { %671 = vmatprep.subr.mxu0 %v1366_v14 }
 0x3de   :  { %672 = vmatpush1.msra.mxu0 %v1373_v15 }
 0x3df   :  { %673 = vmatprep.subr.mxu0 %v1380_v16 }
 0x3e0   :  { %674 = vmatpush1.msra.mxu0 %v1387_v17 }
 0x3e1   :  { %675 = vmatprep.subr.mxu0 %v1394_v18 }
 0x3e2   :  { %676 = vmatpush1.msra.mxu0 %v1401_v19 }
 0x3e3   :  { %677 = vmatprep.subr.mxu0 %v1408_v20 }
 0x3e4   :  { %678 = vmatpush1.msra.mxu0 %v1415_v21 }
 0x3e5   :  { %865 = vmatprep.subr.mxu0 %v1303_v1 }
 0x495   :  { %v511_v28 = vpop.f32.mrf.mxu0 }
 0x496   :  { %v516_v29 = vadd.f32 %v511_v28, %v160_v34  ;;  %v643_v28 = vld [vmem:[#allocation3 + $0x48] sm:$0xff] }
 0x497   :  { %v513_v63 = vpop.f32.mrf.mxu0 }
 0x498   :  { %v1162_v60 = vmul.f32 -1.442695, %v516_v29  ;;  %v523_v0 = vadd.f32 %v1466_v39, %v513_v63 }
 0x49a   :  { %1218 = vpow2.f32 %v1162_v60 }
 0x4a7   :  { %v1219_v61 = vpop.eup %1218 }
 0x4a8   :  { %v520_v62 = vadd.f32 1.0, %v1219_v61 }
 0x4aa   :  { %1220 = vrcp.f32 %v520_v62 }
 0x4b7   :  { %v1221_v2 = vpop.eup %1220 }
 0x4b8   :  { %v524_v5 = vmul.f32 %v1221_v2, %v523_v0 }
 0x4ba   :  { %v525_v9 = vadd.f32 %v524_v5, %v441_v7 }
 0x4bc   :  { %1222 = vtanh.f32 %v525_v9 }
 0x4c9   :  { %v1223_v22 = vpop.eup %1222 }
 0x4ca   :  { %v527_v23 = vsub.f32 %v436_v59, %v1223_v22 }
 0x4cc   :  { %529 = vrot.lane.b32.xlu0 %v527_v23, %s1255_s4 }
 0x53e   :  { %v530_v24 = vpop.permute.xlu0 %529 }
 0x53f   :  { %v532_v25 = vmul.f32 %v1221_v2, %v530_v24 }
 0x541   :  { %534 = vrot.lane.b32.xlu1 %v532_v25, %s1255_s4 }
 0x5b3   :  { %v535_v26 = vpop.permute.xlu1 %534 }
 0x5b4   :  { %v537_v27 = vadd.f32 %v1223_v22, %v535_v26 }
 0x5b6   :  { %1163 = vmatmul.mubr.msk.f32.vlgmr.msra.gmra.mxu1 %vm30_vm0, %v537_v27 }
 0x5b7   :  { %765 = vmatpush1.msra.mxu1 %v1316_v4  ;;  %812 = vmatprep.mubr.f32.mxu1 %v1254_v3 }
 0x5b8   :  { %766 = vmatprep.subr.mxu1 %v1324_v6 }
 0x5b9   :  { %767 = vmatpush1.msra.mxu1 %v1333_v8 }
 0x5ba   :  { %768 = vmatprep.subr.mxu1 %v1342_v10 }
 0x5bb   :  { %769 = vmatpush1.msra.mxu1 %v1347_v11 }
 0x5bc   :  { %770 = vmatprep.subr.mxu1 %v1353_v12 }
 0x5bd   :  { %771 = vmatpush1.msra.mxu1 %v1360_v13 }
 0x5be   :  { %772 = vmatprep.subr.mxu1 %v1366_v14 }
 0x5bf   :  { %773 = vmatpush1.msra.mxu1 %v1373_v15 }
 0x5c0   :  { %774 = vmatprep.subr.mxu1 %v1380_v16 }
 0x5c1   :  { %775 = vmatpush1.msra.mxu1 %v1387_v17 }
 0x5c2   :  { %776 = vmatprep.subr.mxu1 %v1394_v18 }
 0x5c3   :  { %777 = vmatpush1.msra.mxu1 %v1401_v19 }
 0x5c4   :  { %778 = vmatprep.subr.mxu1 %v1408_v20 }
 0x5c5   :  { %779 = vmatpush1.msra.mxu1 %v1415_v21 }
 0x5c6   :  { %966 = vmatprep.subr.mxu1 %v1303_v1 }
 0x676   :  { %v612_v30 = vpop.f32.mrf.mxu1 }
 0x677   :  { %v617_v31 = vadd.f32 %v612_v30, %v1535_v38  ;;  %v845_v30 = vld [vmem:[#allocation3 + $0x68] sm:$0xff] }
 0x678   :  { %v614_v35 = vpop.f32.mrf.mxu1 }
 0x679   :  { %v1164_v32 = vmul.f32 -1.442695, %v617_v31  ;;  %v624_v36 = vadd.f32 %v1466_v39, %v614_v35 }
 0x67b   :  { %1224 = vpow2.f32 %v1164_v32 }
 0x688   :  { %v1225_v33 = vpop.eup %1224 }
 0x689   :  { %v621_v34 = vadd.f32 1.0, %v1225_v33 }
 0x68b   :  { %1226 = vrcp.f32 %v621_v34 }
 0x698   :  { %v1227_v37 = vpop.eup %1226 }
 0x699   :  { %v625_v40 = vmul.f32 %v1227_v37, %v624_v36 }
 0x69b   :  { %v626_v42 = vadd.f32 %v625_v40, %v542_v41 }
 0x69d   :  { %1228 = vtanh.f32 %v626_v42 }
 0x6aa   :  { %v1229_v44 = vpop.eup %1228 }
 0x6ab   :  { %v628_v45 = vsub.f32 %v537_v27, %v1229_v44 }
 0x6ad   :  { %630 = vrot.lane.b32.xlu0 %v628_v45, %s1255_s4 }
 0x71f   :  { %v631_v1 = vpop.permute.xlu0 %630 }
 0x720   :  { %v633_v46 = vmul.f32 %v1227_v37, %v631_v1 }
 0x722   :  { %635 = vrot.lane.b32.xlu1 %v633_v46, %s1255_s4 }
 0x794   :  { %v636_v38 = vpop.permute.xlu1 %635 }
 0x795   :  { %v638_v48 = vadd.f32 %v1229_v44, %v636_v38 }
 0x797   :  { %1165 = vmatmul.mubr.msk.f32.vlgmr.msra.gmra.mxu0 %vm30_vm0, %v638_v48 }
 0x798   :  { %866 = vmatpush1.msra.mxu0 %v1316_v4  ;;  %913 = vmatprep.mubr.f32.mxu0 %v1254_v3 }
 0x799   :  { %867 = vmatprep.subr.mxu0 %v1324_v6 }
 0x79a   :  { %868 = vmatpush1.msra.mxu0 %v1333_v8 }
 0x79b   :  { %869 = vmatprep.subr.mxu0 %v1342_v10 }
 0x79c   :  { %870 = vmatpush1.msra.mxu0 %v1347_v11 }
 0x79d   :  { %871 = vmatprep.subr.mxu0 %v1353_v12 }
 0x79e   :  { %872 = vmatpush1.msra.mxu0 %v1360_v13 }
 0x79f   :  { %873 = vmatprep.subr.mxu0 %v1366_v14 }
 0x7a0   :  { %874 = vmatpush1.msra.mxu0 %v1373_v15 }
 0x7a1   :  { %875 = vmatprep.subr.mxu0 %v1380_v16 }
 0x7a2   :  { %876 = vmatpush1.msra.mxu0 %v1387_v17 }
 0x7a3   :  { %877 = vmatprep.subr.mxu0 %v1394_v18 }
 0x7a4   :  { %878 = vmatpush1.msra.mxu0 %v1401_v19 }
 0x7a5   :  { %879 = vmatprep.subr.mxu0 %v1408_v20 }
 0x7a6   :  { %880 = vmatpush1.msra.mxu0 %v1415_v21 }
 0x7a7   :  { %1184 = vmatprep.subr.mxu0 %v1254_v3 }
 0x857   :  { %v713_v49 = vpop.f32.mrf.mxu0 }
 0x858   :  { %v718_v50 = vadd.f32 %v713_v49, %v1540_v43 }
 0x859   :  { %v715_v56 = vpop.f32.mrf.mxu0 }
 0x85a   :  { %v1166_v52 = vmul.f32 -1.442695, %v718_v50  ;;  %v725_v57 = vadd.f32 %v1466_v39, %v715_v56  ;;  %v1054_v50 = vld [vmem:[%s1700_s5 + $0x38] sm:$0xff] }
 0x85c   :  { %1230 = vpow2.f32 %v1166_v52  ;;  %v1051_v52 = vld [vmem:[%s1700_s5 + $0x20] sm:$0xff] }
 0x869   :  { %v1231_v53 = vpop.eup %1230 }
 0x86a   :  { %v722_v54 = vadd.f32 1.0, %v1231_v53  ;;  %v1050_v53 = vld [vmem:[%s1700_s5 + $0x18] sm:$0xff] }
 0x86c   :  { %1232 = vrcp.f32 %v722_v54 }
 0x879   :  { %v1233_v58 = vpop.eup %1232 }
 0x87a   :  { %v726_v59 = vmul.f32 %v1233_v58, %v725_v57  ;;  %v1049_v57 = vld [vmem:[%s1700_s5 + $0x10] sm:$0xff] }
 0x87c   :  { %v727_v29 = vadd.f32 %v726_v59, %v643_v28  ;;  %v1047_v59 = vld [vmem:[%s1700_s5] sm:$0xff] }
 0x87e   :  { %1234 = vtanh.f32 %v727_v29 }
 0x88b   :  { %v1235_v60 = vpop.eup %1234 }
 0x88c   :  { %v729_v61 = vsub.f32 %v638_v48, %v1235_v60  ;;  %v946_v48 = vld [vmem:[#allocation3 + $0x78] sm:$0xff] }
 0x88e   :  { %731 = vrot.lane.b32.xlu0 %v729_v61, %s1255_s4 }
 0x900   :  { %v732_v62 = vpop.permute.xlu0 %731 }
 0x901   :  { %v734_v63 = vmul.f32 %v1233_v58, %v732_v62  ;;  %v1048_v58 = vld [vmem:[%s1700_s5 + $0x8] sm:$0xff]  ;;  %v1173_v62 = vld [vmem:[%s1701_s6] ss:$0 sm:$0xff] }
 0x903   :  { %736 = vrot.lane.b32.xlu1 %v734_v63, %s1255_s4 }
 0x975   :  { %v737_v43 = vpop.permute.xlu1 %736 }
 0x976   :  { %v739_v0 = vadd.f32 %v1235_v60, %v737_v43 }
 0x978   :  { %1167 = vmatmul.mubr.msk.f32.vlgmr.msra.gmra.mxu1 %vm30_vm0, %v739_v0 }
 0x979   :  { %967 = vmatpush1.msra.mxu1 %v1316_v4  ;;  %1014 = vmatprep.mubr.f32.mxu1 %v1254_v3 }
 0x97a   :  { %968 = vmatprep.subr.mxu1 %v1324_v6 }
 0x97b   :  { %969 = vmatpush1.msra.mxu1 %v1333_v8 }
 0x97c   :  { %970 = vmatprep.subr.mxu1 %v1342_v10 }
 0x97d   :  { %971 = vmatpush1.msra.mxu1 %v1347_v11 }
 0x97e   :  { %972 = vmatprep.subr.mxu1 %v1353_v12 }
 0x97f   :  { %973 = vmatpush1.msra.mxu1 %v1360_v13 }
 0x980   :  { %974 = vmatprep.subr.mxu1 %v1366_v14 }
 0x981   :  { %975 = vmatpush1.msra.mxu1 %v1373_v15 }
 0x982   :  { %976 = vmatprep.subr.mxu1 %v1380_v16  ;;  %v744_v16 = vld [vmem:[#allocation3 + $0x58] sm:$0xff] }
 0x983   :  { %977 = vmatpush1.msra.mxu1 %v1387_v17 }
 0x984   :  { %978 = vmatprep.subr.mxu1 %v1394_v18 }
 0x985   :  { %979 = vmatpush1.msra.mxu1 %v1401_v19 }
 0x986   :  { %980 = vmatprep.subr.mxu1 %v1408_v20 }
 0x987   :  { %981 = vmatpush1.msra.mxu1 %v1415_v21 }
 0xa38   :  { %v814_v4 = vpop.f32.mrf.mxu1 }
 0xa39   :  { %v819_v6 = vadd.f32 %v814_v4, %v1545_v47 }
 0xa3a   :  { %v816_v12 = vpop.f32.mrf.mxu1 }
 0xa3b   :  { %v1168_v8 = vmul.f32 -1.442695, %v819_v6  ;;  %v826_v13 = vadd.f32 %v1466_v39, %v816_v12 }
 0xa3d   :  { %1236 = vpow2.f32 %v1168_v8 }
 0xa4a   :  { %v1237_v10 = vpop.eup %1236 }
 0xa4b   :  { %v823_v11 = vadd.f32 1.0, %v1237_v10 }
 0xa4d   :  { %1238 = vrcp.f32 %v823_v11 }
 0xa5a   :  { %v1239_v14 = vpop.eup %1238 }
 0xa5b   :  { %v827_v15 = vmul.f32 %v1239_v14, %v826_v13 }
 0xa5d   :  { %v828_v17 = vadd.f32 %v827_v15, %v744_v16 }
 0xa5f   :  { %1240 = vtanh.f32 %v828_v17 }
 0xa6c   :  { %v1241_v18 = vpop.eup %1240 }
 0xa6d   :  { %v830_v19 = vsub.f32 %v739_v0, %v1241_v18 }
 0xa6f   :  { %832 = vrot.lane.b32.xlu0 %v830_v19, %s1255_s4 }
 0xae1   :  { %v833_v20 = vpop.permute.xlu0 %832 }
 0xae2   :  { %v835_v21 = vmul.f32 %v1239_v14, %v833_v20 }
 0xae4   :  { %837 = vrot.lane.b32.xlu1 %v835_v21, %s1255_s4 }
 0xb56   :  { %v838_v47 = vpop.permute.xlu1 %837 }
 0xb57   :  { %v840_v2 = vadd.f32 %v1241_v18, %v838_v47 }
 0xb59   :  { %1169 = vmatmul.mubr.msk.f32.vlgmr.msra.gmra.mxu0 %vm30_vm0, %v840_v2 }
 0xb5a   :  { %1185 = vmatpush3.msra.mxu0 %v1054_v50  ;;  %1200 = vmatprep.mubr.msk.f32.mxu0 %vm1256_vm2, %v1254_v3 }
 0xb5b   :  { %1186 = vmatprep.subr.mxu0 %v1254_v3 }
 0xc19   :  { %v915_v5 = vpop.f32.mrf.mxu0 }
 0xc1a   :  { %v920_v7 = vadd.f32 %v915_v5, %v1550_v51 }
 0xc1b   :  { %v917_v24 = vpop.f32.mrf.mxu0 }
 0xc1c   :  { %v1170_v9 = vmul.f32 -1.442695, %v920_v7  ;;  %v927_v25 = vadd.f32 %v1466_v39, %v917_v24 }
 0xc1e   :  { %1242 = vpow2.f32 %v1170_v9 }
 0xc2b   :  { %v1243_v22 = vpop.eup %1242 }
 0xc2c   :  { %v924_v23 = vadd.f32 1.0, %v1243_v22 }
 0xc2e   :  { %1244 = vrcp.f32 %v924_v23 }
 0xc3b   :  { %v1245_v26 = vpop.eup %1244 }
 0xc3c   :  { %v928_v27 = vmul.f32 %v1245_v26, %v927_v25 }
 0xc3e   :  { %v929_v31 = vadd.f32 %v928_v27, %v845_v30 }
 0xc40   :  { %1246 = vtanh.f32 %v929_v31 }
 0xc4d   :  { %v1247_v32 = vpop.eup %1246 }
 0xc4e   :  { %v931_v33 = vsub.f32 %v840_v2, %v1247_v32 }
 0xc50   :  { %933 = vrot.lane.b32.xlu0 %v931_v33, %s1255_s4 }
 0xcc2   :  { %v934_v34 = vpop.permute.xlu0 %933 }
 0xcc3   :  { %v936_v35 = vmul.f32 %v1245_v26, %v934_v34 }
 0xcc5   :  { %938 = vrot.lane.b32.xlu1 %v936_v35, %s1255_s4 }
 0xd37   :  { %v939_v51 = vpop.permute.xlu1 %938 }
 0xd38   :  { %v941_v36 = vadd.f32 %v1247_v32, %v939_v51 }
 0xd3a   :  { %1171 = vmatmul.mubr.msk.f32.vlgmr.msra.gmra.mxu1 %vm30_vm0, %v941_v36 }
 0xdfa   :  { %v1016_v37 = vpop.f32.mrf.mxu1 }
 0xdfb   :  { %v1021_v40 = vadd.f32 %v1016_v37, %v1555_v55  ;;  %v1053_v55 = vld [vmem:[%s1700_s5 + $0x30] sm:$0xff] }
 0xdfc   :  { %v1018_v45 = vpop.f32.mrf.mxu1  ;;  %1187 = vmatpush3.msra.mxu0 %v1053_v55 }
 0xdfd   :  { %v1172_v41 = vmul.f32 -1.442695, %v1021_v40  ;;  %v1028_v1 = vadd.f32 %v1466_v39, %v1018_v45  ;;  %v1052_v39 = vld [vmem:[%s1700_s5 + $0x28] sm:$0xff]  ;;  %1188 = vmatprep.subr.mxu0 %v1254_v3 }
 0xdfe   :  { %1189 = vmatpush3.msra.mxu0 %v1052_v39 }
 0xdff   :  { %1248 = vpow2.f32 %v1172_v41  ;;  %1190 = vmatprep.subr.mxu0 %v1254_v3 }
 0xe00   :  { %1191 = vmatpush3.msra.mxu0 %v1051_v52 }
 0xe01   :  { %1192 = vmatprep.subr.mxu0 %v1254_v3 }
 0xe02   :  { %1193 = vmatpush3.msra.mxu0 %v1050_v53 }
 0xe03   :  { %1194 = vmatprep.subr.mxu0 %v1254_v3 }
 0xe04   :  { %1195 = vmatpush3.msra.mxu0 %v1049_v57 }
 0xe05   :  { %1196 = vmatprep.subr.mxu0 %v1254_v3 }
 0xe06   :  { %1197 = vmatpush3.msra.mxu0 %v1048_v58 }
 0xe07   :  { %1198 = vmatprep.subr.mxu0 %v1254_v3 }
 0xe08   :  { %1199 = vmatpush3.msra.mxu0 %v1047_v59 }
 0xe0c   :  { %v1249_v42 = vpop.eup %1248 }
 0xe0d   :  { %v1025_v44 = vadd.f32 1.0, %v1249_v42 }
 0xe0f   :  { %1250 = vrcp.f32 %v1025_v44 }
 0xe1c   :  { %v1251_v46 = vpop.eup %1250 }
 0xe1d   :  { %v1029_v38 = vmul.f32 %v1251_v46, %v1028_v1 }
 0xe1f   :  { %v1030_v49 = vadd.f32 %v1029_v38, %v946_v48 }
 0xe21   :  { %1252 = vtanh.f32 %v1030_v49 }
 0xe2e   :  { %v1253_v54 = vpop.eup %1252 }
 0xe2f   :  { %v1032_v56 = vsub.f32 %v941_v36, %v1253_v54 }
 0xe31   :  { %1034 = vrot.lane.b32.xlu0 %v1032_v56, %s1255_s4 }
 0xea3   :  { %v1035_v28 = vpop.permute.xlu0 %1034 }
 0xea4   :  { %v1037_v29 = vmul.f32 %v1251_v46, %v1035_v28 }
 0xea6   :  { %1039 = vrot.lane.b32.xlu1 %v1037_v29, %s1255_s4 }
 0xf18   :  { %v1040_v60 = vpop.permute.xlu1 %1039 }
 0xf19   :  { %v1042_v61 = vadd.f32 %v1253_v54, %v1040_v60 }
 0xf1b   :  { %1043 = vst.msk [vmem:[#allocation2] sm:$0xff] %vm30_vm0, %v1042_v61  ;;  %1201 = vmatmul.mubr.msk.f32.vlgmr.msra.gmra.mxu0 %vm30_vm0, %v1042_v61 }
 0xfdb   :  { %v1131_v63 = vpop.f32.mrf.mxu0 }
 0xfdc   :  { %v1132_v43 = vadd.f32 %v1173_v62, %v1131_v63 }
 0xfdd   :  { %v1202_v0 = vpop.f32.mrf.mxu0 }
 0xfde   :  { %1136 = vst.msk [vmem:[%s1702_s7] sm:$0xff] %vm1135_vm3, %v1132_v43 }

</bundles_post_ra>
